<compile_context>
chip_gen: v6e
topology: v6e:2x2x1
jax: 0.10.0
libtpu: 0.0.40
codegen_flags: <defaults>
</compile_context>

<pallas_src>
import functools

import jax
import jax.numpy as jnp
from jax.experimental import pallas as pl
from jax.experimental.pallas import tpu as pltpu


# ----------------------------------------------------------------------------
# Device introspection (only used for tile / precision heuristics).
# ----------------------------------------------------------------------------
def _device_kind():
    try:
        return jax.devices()[0].device_kind.lower()
    except Exception:  # pragma: no cover
        return ""


def _is_v5():
    return "v5" in _device_kind()


def _num_tensorcores():
    # v7x (and v4 megacore) shard "parallel" grid axes across 2 TensorCores.
    k = _device_kind()
    return 2 if ("v7" in k or "v4" in k) else 1


# ----------------------------------------------------------------------------
# Kernel: one MXU pass per (tm, K) row tile against the folded weight.
# ----------------------------------------------------------------------------
def _matmul_bias_kernel(x_ref, w_ref, b_ref, o_ref, *, precision):
    # x_ref: (tm, K)   w_ref: (K, N)   b_ref: (1, N) f32   o_ref: (tm, N)
    acc = jnp.dot(x_ref[...], w_ref[...],
                  preferred_element_type=jnp.float32, precision=precision)
    o_ref[...] = (acc + b_ref[...]).astype(o_ref.dtype)


def _mxu_precision(compute_dtype, block_diag_factor):
    """f32 MXU precision choice.  HIGHEST buys no accuracy here (effective
    contraction depth is only p*p) and costs extra MXU passes on top of the
    block-diagonal FLOP inflation, which can flip v5e MXU-bound; keep it only
    where it hides under the HBM bound (v6e/v7x, modest inflation)."""
    if jnp.dtype(compute_dtype) != jnp.float32:
        return None
    if _is_v5() or block_diag_factor > 32:
        return jax.lax.Precision.DEFAULT
    return jax.lax.Precision.HIGHEST


def _pick_row_tile(n_rows, K, N, in_itemsize, out_itemsize, w_bytes, *,
                   target_tm=1024, vmem_budget=24 * 1024 * 1024):
    """Biggest row tile (multiple of 8) whose double-buffered in/out tiles plus
    the resident folded weight fit the VMEM budget.  No artificial minimum on
    grid steps (perf review), except >= 1 step per TensorCore on dual-TC parts
    so the 'parallel' axis feeds both HBM paths."""
    rows8 = pl.cdiv(max(n_rows, 1), 8) * 8
    bytes_per_row = 2 * K * in_itemsize + 2 * N * out_itemsize
    fit = max(8, ((vmem_budget - w_bytes) // bytes_per_row) // 8 * 8)
    tm = min(target_tm, rows8, fit)
    n_tc = _num_tensorcores()
    if n_tc > 1 and rows8 >= n_tc * 8:
        tm = min(tm, pl.cdiv(rows8 // 8, n_tc) * 8)
    return max(int(tm), 8)


def _fold_weight(weight, bias, j_of_q, f_of_q, n_patches, compute_dtype):
    """Expand the (E, pp) Linear weight into a permuted block-diagonal
    (K, n_patches*E) matrix such that, for a packed activation row `a` with
    a[q] == patch_{j_of_q[q]}[f_of_q[q]],
        a @ w_fold + b_fold == concat_j (patch_j @ weight.T + bias).
    Cheap (one elementwise pass over K*N); hoist per weight in a real model.
    """
    E = weight.shape[0]
    wt_rows = weight.astype(compute_dtype).T[f_of_q]                 # (K, E)
    N = n_patches * E
    col_patch = jnp.arange(N, dtype=jnp.int32) // E                  # (N,)
    mask = (col_patch[None, :] == j_of_q[:, None]).astype(compute_dtype)
    w_fold = mask * jnp.tile(wt_rows, (1, n_patches))                # (K, N)
    b_fold = jnp.tile(bias.astype(jnp.float32), (n_patches,)).reshape(1, N)
    return w_fold, b_fold


def _packed_linear(a, w_fold, b_fold, tm, out_dtype, precision):
    """a: (M, K) with M % tm == 0;  returns (M, N) in out_dtype."""
    M, K = a.shape
    _, N = w_fold.shape
    assert M % tm == 0
    return pl.pallas_call(
        functools.partial(_matmul_bias_kernel, precision=precision),
        out_shape=jax.ShapeDtypeStruct((M, N), out_dtype),
        grid_spec=pltpu.PrefetchScalarGridSpec(
            num_scalar_prefetch=0,
            grid=(M // tm,),
            in_specs=[
                pl.BlockSpec((tm, K), lambda i: (i, 0)),
                # Grid-invariant blocks: constant index map -> fetched once and
                # kept resident in VMEM across all grid steps.
                pl.BlockSpec((K, N), lambda i: (0, 0)),
                pl.BlockSpec((1, N), lambda i: (0, 0)),
            ],
            out_specs=pl.BlockSpec((tm, N), lambda i: (i, 0)),
        ),
        compiler_params=pltpu.CompilerParams(
            dimension_semantics=("parallel",),
            vmem_limit_bytes=32 * 1024 * 1024,
        ),
    )(a, w_fold, b_fold)


def linear_embed(x, weight, bias, patch_size, *, compute_dtype=None,
                 out_dtype=None, fuse_weight_limit_bytes=4 * 1024 * 1024):
    """Pallas-TPU forward of LinearEmbed.

    x:      (B, C, H, W)
    weight: (embed_dim, patch_size**2)   (PyTorch nn.Linear layout)
    bias:   (embed_dim,)
    returns (B, (H//p)*(W//p), embed_dim)  (== (B, (H//p)**2, E) for H == W)
    """
    B, C, H, W = x.shape
    p = patch_size
    E, in_features = weight.shape
    assert in_features == C * p * p, "Linear in_features mismatch (requires C == 1)"
    assert H % p == 0 and W % p == 0

    out_dtype = jnp.dtype(out_dtype if out_dtype is not None else x.dtype)
    cdt = jnp.dtype(compute_dtype if compute_dtype is not None else x.dtype)
    if x.dtype != cdt:
        # Cast before any layout glue so XLA fuses the convert upstream and all
        # downstream streams (incl. the kernel's input DMA) are half-width.
        x = x.astype(cdt)

    Hp, Wp = H // p, W // p
    seq_len = Hp * Wp
    in_sz, out_sz = cdt.itemsize, out_dtype.itemsize

    use_fused = (C == 1) and (p * W) * (Wp * E) * in_sz <= fuse_weight_limit_bytes
    if use_fused:
        # ---- fused patch extraction: fold the patch permutation into the weight.
        # One kernel row = one p-row band of the image = a FREE row-major reshape
        # of NCHW x; no transposed copy of x is ever materialized.
        K, N = p * W, Wp * E
        q = jnp.arange(K, dtype=jnp.int32)
        r, w = q // W, q % W
        j_of_q = w // p                         # patch index within the row band
        f_of_q = r * p + (w % p)                # Linear input-feature index
        block_diag_factor = Wp
        w_fold, b_fold = _fold_weight(weight, bias, j_of_q, f_of_q, Wp, cdt)

        n_rows = B * Hp
        tm = _pick_row_tile(n_rows, K, N, in_sz, out_sz, K * N * in_sz + N * 4)
        n_rows_pad = pl.cdiv(n_rows, tm) * tm
        a = x.reshape(n_rows, K)                # free row-major reshape (C == 1)
        if n_rows_pad != n_rows:                # at most one pad of the activation
            a = jnp.pad(a, ((0, n_rows_pad - n_rows), (0, 0)))
    else:
        # ---- fallback for very wide rows (folded weight would not fit VMEM):
        # materialize the patch transpose in plain JAX (cast already fused above),
        # then pack K=128 (v5e) / K=256 (v6e/v7x) worth of patches per kernel row.
        # TODO(synk): fuse this case too by chunking each row band over a second
        # grid axis (needs an in-kernel (p, chunk, p) relayout).
        pp = C * p * p
        xr = x.reshape(B, C, Hp, p, Wp, p)
        xr = jnp.transpose(xr, (0, 2, 4, 1, 3, 5)).reshape(B * seq_len, pp)
        k_target = 128 if _is_v5() else 256
        R = max(1, k_target // pp)
        K, N = R * pp, R * E
        block_diag_factor = R
        q = jnp.arange(K, dtype=jnp.int32)
        w_fold, b_fold = _fold_weight(weight, bias, q // pp, q % pp, R, cdt)

        n_rows = pl.cdiv(B * seq_len, R)
        tm = _pick_row_tile(n_rows, K, N, in_sz, out_sz, K * N * in_sz + N * 4)
        n_rows_pad = pl.cdiv(n_rows, tm) * tm
        m_pad = n_rows_pad * R
        if m_pad != B * seq_len:                # at most one pad of the activation
            xr = jnp.pad(xr, ((0, m_pad - B * seq_len), (0, 0)))
        a = xr.reshape(n_rows_pad, K)           # free row-major refold

    prec = _mxu_precision(cdt, block_diag_factor)
    out = _packed_linear(a, w_fold, b_fold, tm, out_dtype, prec)
    # Free row-major reshape, then a single slice (fuses into the consumer).
    out = out.reshape(-1, E)[: B * seq_len]
    return out.reshape(B, seq_len, E)


# ----------------------------------------------------------------------------
# Self-test.
# ----------------------------------------------------------------------------
if __name__ == "__main__":
    patch_size, embed_dim = 4, 32
    pp = patch_size ** 2

    key = jax.random.PRNGKey(0)
    kx, kw, kb = jax.random.split(key, 3)

    # Deterministic PyTorch-style init: U(-1/sqrt(in), 1/sqrt(in)).
    bound = 1.0 / (pp ** 0.5)
    weight = jax.random.uniform(kw, (embed_dim, pp), jnp.float32, -bound, bound)
    bias = jax.random.uniform(kb, (embed_dim,), jnp.float32, -bound, bound)

    def ref_forward(x):
        b, c, h, w = x.shape
        xr = x.reshape(b, c, h // patch_size, patch_size, w // patch_size, patch_size)
        xr = jnp.transpose(xr, (0, 2, 4, 1, 3, 5)).reshape(b, (h // patch_size) ** 2, -1)
        return jnp.dot(xr, weight.T, precision=jax.lax.Precision.HIGHEST) + bias

    # f32 tolerance tracks the MXU precision the kernel picks
    # (HIGHEST off v5e, DEFAULT on v5e per the perf review).
    f32_tol = (dict(atol=2e-2, rtol=2e-2) if _is_v5()
               else dict(atol=1e-4, rtol=1e-4))

    # C must be 1 for nn.Linear(p**2, E) to match (as in the PyTorch module).
    cases = [(2, 1, 16, 16),   # primary small shape (single grid step)
             (2, 1, 20, 20),   # ragged rows -> exercises the pad path
             (2, 1, 64, 64)]   # lane-dense K=256 / N=512, multi-step on v7x
    for (B, C, H, W) in cases:
        x = jax.random.normal(jax.random.fold_in(kx, H), (B, C, H, W), jnp.float32)
        want = ref_forward(x)

        got = jax.block_until_ready(linear_embed(x, weight, bias, patch_size))
        assert got.shape == (B, (H // patch_size) ** 2, embed_dim)
        assert jnp.allclose(got, want, **f32_tol), f"f32 mismatch at {(B, C, H, W)}"

        got_bf16 = jax.block_until_ready(
            linear_embed(x, weight, bias, patch_size,
                         compute_dtype=jnp.bfloat16, out_dtype=jnp.bfloat16))
        assert jnp.allclose(got_bf16.astype(jnp.float32), want, atol=5e-2, rtol=5e-2), \
            f"bf16 mismatch at {(B, C, H, W)}"

    # Exercise the wide-row fallback path (forced via a tiny fold-weight limit).
    x = jax.random.normal(jax.random.fold_in(kx, 7), (2, 1, 64, 64), jnp.float32)
    got_fb = jax.block_until_ready(
        linear_embed(x, weight, bias, patch_size, fuse_weight_limit_bytes=1))
    assert jnp.allclose(got_fb, ref_forward(x), **f32_tol), "fallback mismatch"

    print("KERNEL_OK")
</pallas_src>

<mosaic_0001>
module attributes {stable_mosaic.version = 11 : i64} {
  func.func @_matmul_bias_kernel(%arg0: i32, %arg1: memref<8x64xf32, #tpu.memory_space<vmem>>, %arg2: memref<64x128xf32, #tpu.memory_space<vmem>>, %arg3: memref<1x128xf32, #tpu.memory_space<vmem>>, %arg4: memref<8x128xf32, #tpu.memory_space<vmem>>) attributes {dimension_semantics = [#tpu.dimension_semantics<parallel>], iteration_bounds = array<i64: 1>, scalar_prefetch = 0 : i64, scratch_operands = 0 : i64, tpu.core_type = #tpu.core_type<tc>, window_params = [{transform_indices = @transform_0, window_bounds = array<i64: 8, 64>}, {pipeline_mode = #tpu.pipeline_mode<synchronous>, transform_indices = @transform_1, window_bounds = array<i64: 64, 128>}, {pipeline_mode = #tpu.pipeline_mode<synchronous>, transform_indices = @transform_2, window_bounds = array<i64: 1, 128>}, {transform_indices = @transform_3, window_bounds = array<i64: 8, 128>}]} {
    %c0 = arith.constant 0 : index
    %c0_0 = arith.constant 0 : index
    %0 = vector.load %arg1[%c0, %c0_0] : memref<8x64xf32, #tpu.memory_space<vmem>>, vector<8x64xf32>
    %c0_1 = arith.constant 0 : index
    %c0_2 = arith.constant 0 : index
    %1 = vector.load %arg2[%c0_1, %c0_2] : memref<64x128xf32, #tpu.memory_space<vmem>>, vector<64x128xf32>
    %cst = arith.constant dense<0.000000e+00> : vector<8x128xf32>
    %2 = tpu.matmul %0, %1, %cst {dimension_numbers = #tpu.dot_dimension_numbers<[1], [0], [0], [1], [0, 0, 1, 1], [], []>, precision = #tpu.contract_precision<fp32>} : vector<8x64xf32>, vector<64x128xf32>, vector<8x128xf32> -> vector<8x128xf32>
    %c0_3 = arith.constant 0 : index
    %c0_4 = arith.constant 0 : index
    %3 = vector.load %arg3[%c0_3, %c0_4] : memref<1x128xf32, #tpu.memory_space<vmem>>, vector<1x128xf32>
    %4 = vector.broadcast %3 : vector<1x128xf32> to vector<8x128xf32>
    %5 = arith.addf %2, %4 : vector<8x128xf32>
    %c0_5 = arith.constant 0 : index
    %c0_6 = arith.constant 0 : index
    %6 = vector.load %arg4[%c0_5, %c0_6] : memref<8x128xf32, #tpu.memory_space<vmem>>, vector<8x128xf32>
    tpu.vector_store %arg4[%c0_5, %c0_6], %5 {strides = array<i32>} : memref<8x128xf32, #tpu.memory_space<vmem>>, vector<8x128xf32>,
    return
  }
  func.func @transform_0(%arg0: i32) -> (i32, i32) {
    %c0_i32 = arith.constant 0 : i32
    %c0_i32_0 = arith.constant 0 : i32
    return %arg0, %c0_i32 : i32, i32
  }
  func.func @transform_1(%arg0: i32) -> (i32, i32) {
    %c0_i32 = arith.constant 0 : i32
    %c0_i32_0 = arith.constant 0 : i32
    %c0_i32_1 = arith.constant 0 : i32
    return %c0_i32, %c0_i32_0 : i32, i32
  }
  func.func @transform_2(%arg0: i32) -> (i32, i32) {
    %c0_i32 = arith.constant 0 : i32
    %c0_i32_0 = arith.constant 0 : i32
    %c0_i32_1 = arith.constant 0 : i32
    return %c0_i32, %c0_i32_0 : i32, i32
  }
  func.func @transform_3(%arg0: i32) -> (i32, i32) {
    %c0_i32 = arith.constant 0 : i32
    %c0_i32_0 = arith.constant 0 : i32
    return %arg0, %c0_i32 : i32, i32
  }
}

</mosaic_0001>

<bundles_post_ra>
// kernel: tpu_custom_call.1
= control target key start
LH: loop header
LB: loop body
LE: loop exit
PB: predicated region body
PF: predicated region fallthrough
CT: control target
= control target key end

     0   :  { %8 = vsyncpa [#allocation3], 0  ;;  %s1092_s0 = inlined_call_operand.hbm [shape: f32[8,64], index: 0, kind: input, shape index: {}]   ;;  %s1093_s1 = inlined_call_operand.hbm [shape: f32[64,128], index: 1, kind: input, shape index: {}]   ;;  %s1094_s2 = inlined_call_operand.vmem [shape: f32[1,128], index: 2, kind: input, shape index: {}]   ;;  %s1095_s3 = inlined_call_operand.hbm [shape: f32[8,128], index: 3, kind: output, shape index: {}]  }
   0x1   :  { %9 = vsyncpa [#allocation6], 0 }
   0x2   :  { %10 = vsyncpa [#allocation4], 0  ;;  %s857_s12 = smov [#allocation2]   ;;  %s858_s14 = smov [#allocation5]  }
   0x3   :  { %s17_s13 = sshll.u32 %s857_s12, 4  ;;  %s26_s15 = sshll.u32 %s858_s14, 4  ;;  %s18_s13 = int_to_ptr.vmem [resolvable:$true] %s17_s13  ;;  %s27_s15 = int_to_ptr.vmem [resolvable:$true] %s26_s15 }
   0x4   :  { %s799_s16 = scalar_lea.vmem %s18_s13, 128  ;;  %p804_p1 = scmp.lt.s32.totalorder %s18_s13, %s18_s13 }
   0x5   :  { %p800_p0 = scmp.ne.s32.totalorder %s18_s13, %s799_s16  ;;  %p805_p2 = scmp.lt.s32.totalorder %s799_s16, %s799_s16 }
   0x7   :  { %p806_p3 = por %p805_p2, %p804_p1 }
   0x9   :  { %p807_p4 = pnand %p806_p3, %p800_p0 }
   0xb   :  { %810 = shalt.err (!%p807_p4)
}
   0xc   :  { %20 = dma.hbm_to_vmem [thread:$0]  %s1092_s0, 128, %s18_s13, [#allocation3]  }
   0xd   :  { %s819_s19 = scalar_lea.vmem %s27_s15, 1024  ;;  %p824_p6 = scmp.lt.s32.totalorder %s27_s15, %s27_s15 }
   0xe   :  { %p820_p5 = scmp.ne.s32.totalorder %s27_s15, %s819_s19  ;;  %p825_p7 = scmp.lt.s32.totalorder %s819_s19, %s819_s19 }
  0x10   :  { %p826_p8 = por %p825_p7, %p824_p6 }
  0x12   :  { %p827_p9 = pnand %p826_p8, %p820_p5 }
  0x14   :  { %830 = shalt.err (!%p827_p9)
}
  0x15   :  { %s859_s20 = smov 128   ;;  %s860_s21 = smov 8  }
  0x16   :  { %32 = dma.hbm_to_vmem [thread:$0]  %s1093_s1, 1024, %s27_s15, [#allocation6], %s859_s20, %s859_s20, %s860_s21  }
  0x17   :  { %851 = dma.done.wait [#allocation3], 128  }
  0x18   :  { %852 = vsyncadd [#allocation3], 4294967168 }
  0x19   :  { %853 = dma.done.wait [#allocation6], 1024  }
  0x1a   :  { %854 = vsyncadd [#allocation6], 4294966272  ;;  %v861_v0 = vmov 0.0   ;;  %vm862_vm0 = vmmov 0   ;;  %v49_v1 = vld [vmem:[#allocation5 + $0x38] sm:$0xff]  ;;  %v48_v2 = vld [vmem:[#allocation5 + $0x30] sm:$0xff] }
  0x1b   :  { %670 = vmatprep.subr.mxu0 %v861_v0  ;;  %689 = vmatprep.subr.mxu1 %v861_v0  ;;  %v47_v3 = vld [vmem:[#allocation5 + $0x28] sm:$0xff]  ;;  %vm57_vm1 = vcmask 523264   ;;  %v896_v4 = vand.u32 4294901760, %v49_v1  ;;  %v898_v5 = vand.u32 4294901760, %v48_v2  ;;  %v46_v7 = vld [vmem:[#allocation5 + $0x20] sm:$0xff]  ;;  %v45_v8 = vld [vmem:[#allocation5 + $0x18] sm:$0xff] }
  0x1c   :  { %686 = vmatprep.mubr.msk.f32.mxu0 %vm862_vm0, %v861_v0  ;;  %705 = vmatprep.mubr.msk.f32.mxu1 %vm862_vm0, %v861_v0  ;;  %v900_v6 = vand.u32 4294901760, %v47_v3  ;;  %v44_v9 = vld [vmem:[#allocation5 + $0x10] sm:$0xff]  ;;  %v902_v10 = vand.u32 4294901760, %v46_v7  ;;  %v904_v11 = vand.u32 4294901760, %v45_v8  ;;  %v43_v13 = vld [vmem:[#allocation5 + $0x8] sm:$0xff]  ;;  %v42_v14 = vld [vmem:[#allocation5] sm:$0xff] }
  0x1d   :  { %v906_v12 = vand.u32 4294901760, %v44_v9  ;;  %v41_v15 = vld [vmem:[#allocation2] sm:$0xff]  ;;  %671 = vmatpush3.msra.mxu0 %v896_v4  ;;  %v910_v16 = vsub.f32 %v49_v1, %v896_v4  ;;  %v913_v17 = vsub.f32 %v48_v2, %v898_v5  ;;  %v915_v18 = vand.u32 4294901760, %v43_v13  ;;  %s863_s24 = smov [#allocation7]  }
  0x1e   :  { %v918_v19 = vsub.f32 %v47_v3, %v900_v6  ;;  %672 = vmatprep.subr.mxu0 %v861_v0  ;;  %v921_v20 = vand.u32 4294901760, %v42_v14  ;;  %v924_v21 = vsub.f32 %v46_v7, %v902_v10  ;;  %v59_v22 = vsel %vm57_vm1, %v41_v15, 0  ;;  %v615_v1 = vld [vmem:[%s1094_s2] ss:$0 sm:$0xff]  ;;  %s605_s25 = sshll.u32 %s863_s24, 4  ;;  %s606_s25 = int_to_ptr.vmem [resolvable:$true] %s605_s25 }
  0x1f   :  { %v928_v23 = vsub.f32 %v45_v8, %v904_v11  ;;  %673 = vmatpush3.msra.mxu0 %v898_v5  ;;  %v163_v24 = vand.u32 4294901760, %v910_v16  ;;  %v170_v25 = vand.u32 4294901760, %v913_v17  ;;  %v934_v27 = vand.u32 4294901760, %v59_v22  ;;  %s831_s26 = scalar_lea.vmem %s606_s25, 128  ;;  %p836_p11 = scmp.lt.s32.totalorder %s606_s25, %s606_s25 }
  0x20   :  { %v177_v26 = vand.u32 4294901760, %v918_v19  ;;  %674 = vmatprep.subr.mxu0 %v861_v0  ;;  %v184_v28 = vand.u32 4294901760, %v924_v21  ;;  %v940_v30 = vsub.f32 %v44_v9, %v906_v12  ;;  %v943_v31 = vsub.f32 %v43_v13, %v915_v18  ;;  %p832_p10 = scmp.ne.s32.totalorder %s606_s25, %s831_s26  ;;  %p837_p12 = scmp.lt.s32.totalorder %s831_s26, %s831_s26 }
  0x21   :  { %v191_v29 = vand.u32 4294901760, %v928_v23  ;;  %675 = vmatpush3.msra.mxu0 %v900_v6  ;;  %v164_v32 = vsub.f32 %v910_v16, %v163_v24  ;;  %v171_v33 = vsub.f32 %v913_v17, %v170_v25  ;;  %v956_v35 = vsub.f32 %v59_v22, %v934_v27 }
  0x22   :  { %v178_v34 = vsub.f32 %v918_v19, %v177_v26  ;;  %676 = vmatprep.subr.mxu0 %v861_v0  ;;  %v185_v36 = vsub.f32 %v924_v21, %v184_v28  ;;  %v198_v40 = vand.u32 4294901760, %v940_v30  ;;  %v205_v44 = vand.u32 4294901760, %v943_v31  ;;  %p838_p13 = por %p837_p12, %p836_p11 }
  0x23   :  { %677 = vmatpush3.msra.mxu0 %v902_v10  ;;  %v165_v37 = vand.u32 4294901760, %v164_v32  ;;  %v172_v38 = vand.u32 4294901760, %v171_v33  ;;  %v136_v39 = vand.u32 4294901760, %v956_v35  ;;  %v192_v41 = vsub.f32 %v928_v23, %v191_v29 }
  0x24   :  { %678 = vmatprep.subr.mxu0 %v861_v0  ;;  %v179_v42 = vand.u32 4294901760, %v178_v34  ;;  %v975_v45 = vsub.f32 %v42_v14, %v921_v20  ;;  %v186_v46 = vand.u32 4294901760, %v185_v36  ;;  %v199_v47 = vsub.f32 %v940_v30, %v198_v40  ;;  %p839_p0 = pnand %p838_p13, %p832_p10 }
  0x25   :  { %679 = vmatpush3.msra.mxu0 %v904_v11  ;;  %690 = vmatpush3.msra.mxu1 %v165_v37  ;;  %v137_v43 = vsub.f32 %v956_v35, %v136_v39  ;;  %v193_v50 = vand.u32 4294901760, %v192_v41  ;;  %v206_v51 = vsub.f32 %v943_v31, %v205_v44 }
  0x26   :  { %680 = vmatprep.subr.mxu0 %v861_v0  ;;  %691 = vmatprep.subr.mxu1 %v861_v0  ;;  %v212_v48 = vand.u32 4294901760, %v975_v45  ;;  %v200_v52 = vand.u32 4294901760, %v199_v47 }
  0x27   :  { %681 = vmatpush3.msra.mxu0 %v906_v12  ;;  %692 = vmatpush3.msra.mxu1 %v172_v38  ;;  %v138_v49 = vand.u32 4294901760, %v137_v43  ;;  %v207_v54 = vand.u32 4294901760, %v206_v51 }
  0x28   :  { %682 = vmatprep.subr.mxu0 %v861_v0  ;;  %693 = vmatprep.subr.mxu1 %v861_v0  ;;  %v213_v53 = vsub.f32 %v975_v45, %v212_v48 }
  0x29   :  { %683 = vmatpush3.msra.mxu0 %v915_v18  ;;  %694 = vmatpush3.msra.mxu1 %v179_v42 }
  0x2a   :  { %684 = vmatprep.subr.mxu0 %v861_v0  ;;  %695 = vmatprep.subr.mxu1 %v861_v0  ;;  %v214_v55 = vand.u32 4294901760, %v213_v53 }
  0x2b   :  { %685 = vmatpush3.msra.mxu0 %v921_v20  ;;  %696 = vmatpush3.msra.mxu1 %v186_v46 }
  0x2c   :  { %697 = vmatprep.subr.mxu1 %v861_v0  ;;  %708 = vmatprep.subr.mxu0 %v861_v0 }
  0x2d   :  { %687 = vmatmul.mubr.f32.vlgmr.msra.gmra.mxu0 %v138_v49  ;;  %698 = vmatpush3.msra.mxu1 %v193_v50 }
  0x2e   :  { %709 = vmatpush3.msra.mxu0 %v910_v16  ;;  %699 = vmatprep.subr.mxu1 %v861_v0 }
  0x2f   :  { %710 = vmatprep.subr.mxu0 %v861_v0  ;;  %700 = vmatpush3.msra.mxu1 %v200_v52 }
  0x30   :  { %711 = vmatpush3.msra.mxu0 %v913_v17  ;;  %701 = vmatprep.subr.mxu1 %v861_v0 }
  0x31   :  { %712 = vmatprep.subr.mxu0 %v861_v0  ;;  %702 = vmatpush3.msra.mxu1 %v207_v54 }
  0x32   :  { %713 = vmatpush3.msra.mxu0 %v918_v19  ;;  %703 = vmatprep.subr.mxu1 %v861_v0 }
  0x33   :  { %714 = vmatprep.subr.mxu0 %v861_v0  ;;  %704 = vmatpush3.msra.mxu1 %v214_v55 }
  0x34   :  { %715 = vmatpush3.msra.mxu0 %v924_v21  ;;  %706 = vmatmul.mubr.f32.vlgmr.msra.gmra.mxu1 %v934_v27 }
  0x35   :  { %716 = vmatprep.subr.mxu0 %v861_v0  ;;  %727 = vmatprep.subr.mxu1 %v861_v0 }
  0x36   :  { %717 = vmatpush3.msra.mxu0 %v928_v23  ;;  %728 = vmatpush3.msra.mxu1 %v896_v4 }
  0x37   :  { %718 = vmatprep.subr.mxu0 %v861_v0  ;;  %729 = vmatprep.subr.mxu1 %v861_v0 }
  0x38   :  { %719 = vmatpush3.msra.mxu0 %v940_v30  ;;  %730 = vmatpush3.msra.mxu1 %v898_v5 }
  0x39   :  { %720 = vmatprep.subr.mxu0 %v861_v0  ;;  %731 = vmatprep.subr.mxu1 %v861_v0 }
  0x3a   :  { %721 = vmatpush3.msra.mxu0 %v943_v31  ;;  %732 = vmatpush3.msra.mxu1 %v900_v6 }
  0x3b   :  { %722 = vmatprep.subr.mxu0 %v861_v0  ;;  %733 = vmatprep.subr.mxu1 %v861_v0 }
  0x3c   :  { %723 = vmatpush3.msra.mxu0 %v975_v45  ;;  %724 = vmatprep.mubr.msk.f32.mxu0 %vm862_vm0, %v861_v0 }
  0x3d   :  { %734 = vmatpush3.msra.mxu1 %v902_v10  ;;  %725 = vmatmul.mubr.f32.vlgmr.msra.gmra.mxu0 %v956_v35 }
  0x3e   :  { %735 = vmatprep.subr.mxu1 %v861_v0  ;;  %746 = vmatprep.subr.mxu0 %v861_v0 }
  0x3f   :  { %736 = vmatpush3.msra.mxu1 %v904_v11  ;;  %747 = vmatpush3.msra.mxu0 %v163_v24 }
  0x40   :  { %737 = vmatprep.subr.mxu1 %v861_v0  ;;  %748 = vmatprep.subr.mxu0 %v861_v0 }
  0x41   :  { %738 = vmatpush3.msra.mxu1 %v906_v12  ;;  %749 = vmatpush3.msra.mxu0 %v170_v25 }
  0x42   :  { %739 = vmatprep.subr.mxu1 %v861_v0  ;;  %750 = vmatprep.subr.mxu0 %v861_v0 }
  0x43   :  { %740 = vmatpush3.msra.mxu1 %v915_v18  ;;  %751 = vmatpush3.msra.mxu0 %v177_v26 }
  0x44   :  { %741 = vmatprep.subr.mxu1 %v861_v0  ;;  %752 = vmatprep.subr.mxu0 %v861_v0 }
  0x45   :  { %742 = vmatpush3.msra.mxu1 %v921_v20  ;;  %743 = vmatprep.mubr.msk.f32.mxu1 %vm862_vm0, %v861_v0 }
  0x46   :  { %753 = vmatpush3.msra.mxu0 %v184_v28  ;;  %744 = vmatmul.mubr.f32.vlgmr.msra.gmra.mxu1 %v136_v39 }
  0x47   :  { %754 = vmatprep.subr.mxu0 %v861_v0  ;;  %765 = vmatprep.subr.mxu1 %v861_v0 }
  0x48   :  { %755 = vmatpush3.msra.mxu0 %v191_v29  ;;  %766 = vmatpush3.msra.mxu1 %v896_v4 }
  0x49   :  { %756 = vmatprep.subr.mxu0 %v861_v0  ;;  %767 = vmatprep.subr.mxu1 %v861_v0 }
  0x4a   :  { %757 = vmatpush3.msra.mxu0 %v198_v40  ;;  %768 = vmatpush3.msra.mxu1 %v898_v5 }
  0x4b   :  { %758 = vmatprep.subr.mxu0 %v861_v0  ;;  %769 = vmatprep.subr.mxu1 %v861_v0 }
  0x4c   :  { %759 = vmatpush3.msra.mxu0 %v205_v44  ;;  %770 = vmatpush3.msra.mxu1 %v900_v6 }
  0x4d   :  { %760 = vmatprep.subr.mxu0 %v861_v0  ;;  %771 = vmatprep.subr.mxu1 %v861_v0 }
  0x4e   :  { %761 = vmatpush3.msra.mxu0 %v212_v48  ;;  %762 = vmatprep.mubr.msk.f32.mxu0 %vm862_vm0, %v861_v0 }
  0x4f   :  { %772 = vmatpush3.msra.mxu1 %v902_v10  ;;  %763 = vmatmul.mubr.f32.vlgmr.msra.gmra.mxu0 %v934_v27 }
  0x50   :  { %773 = vmatprep.subr.mxu1 %v861_v0  ;;  %781 = vmatprep.mubr.msk.f32.mxu1 %vm862_vm0, %v861_v0 }
  0x51   :  { %774 = vmatpush3.msra.mxu1 %v904_v11 }
  0x52   :  { %775 = vmatprep.subr.mxu1 %v861_v0 }
  0x53   :  { %776 = vmatpush3.msra.mxu1 %v906_v12 }
  0x54   :  { %777 = vmatprep.subr.mxu1 %v861_v0 }
  0x55   :  { %778 = vmatpush3.msra.mxu1 %v915_v18 }
  0x56   :  { %779 = vmatprep.subr.mxu1 %v861_v0 }
  0x57   :  { %780 = vmatpush3.msra.mxu1 %v921_v20 }
  0x58   :  { %782 = vmatmul.mubr.f32.vlgmr.msra.gmra.mxu1 %v934_v27 }
  0xed   :  { %v140_v56 = vpop.f32.mrf.mxu0 }
  0xee   :  { %v141_v2 = vadd.f32 %v615_v1, %v140_v56 }
  0xef   :  { %v688_v57 = vpop.f32.mrf.mxu0 }
  0xf4   :  { %v251_v58 = vpop.f32.mrf.mxu1 }
  0xf5   :  { %v252_v4 = vadd.f32 %v251_v58, %v141_v2 }
  0xf6   :  { %v707_v59 = vpop.f32.mrf.mxu1 }
  0xfd   :  { %v339_v60 = vpop.f32.mrf.mxu0 }
  0xfe   :  { %v340_v5 = vadd.f32 %v339_v60, %v252_v4 }
  0xff   :  { %v726_v61 = vpop.f32.mrf.mxu0 }
 0x106   :  { %v420_v62 = vpop.f32.mrf.mxu1 }
 0x107   :  { %v421_v6 = vadd.f32 %v420_v62, %v340_v5 }
 0x108   :  { %v745_v63 = vpop.f32.mrf.mxu1 }
 0x10f   :  { %v515_v3 = vpop.f32.mrf.mxu0 }
 0x110   :  { %v516_v7 = vadd.f32 %v515_v3, %v421_v6 }
 0x111   :  { %v764_v0 = vpop.f32.mrf.mxu0 }
 0x118   :  { %v594_v8 = vpop.f32.mrf.mxu1 }
 0x119   :  { %v595_v9 = vadd.f32 %v594_v8, %v516_v7 }
 0x11a   :  { %v783_v10 = vpop.f32.mrf.mxu1 }
 0x11b   :  { %598 = vst [vmem:[#allocation7] sm:$0xff] %v595_v9 }
 0x11c   :  { %842 = shalt.err (!%p839_p0)
}
 0x11d   :  { %608 = dma.vmem_to_hbm [thread:$0]  %s606_s25, 128, %s1095_s3, [#allocation4]  }
 0x11e   :  { %855 = dma.done.wait [#allocation4], 128  }
 0x11f   :  { %856 = vsyncadd [#allocation4], 4294967168 }
 0x120   :  { %612 = vsyncpa [#allocation3], 1 }
 0x121   :  { %613 = vsyncpa [#allocation6], 1 }
 0x122   :  { %614 = vsyncpa [#allocation4], 1 }

</bundles_post_ra>
